<compile_context>
chip_gen: v7x
topology: tpu7x:2x2x1
jax: 0.10.0
libtpu: 0.0.40
codegen_flags: <defaults>
</compile_context>

<pallas_src>
import math

import jax
import jax.numpy as jnp
from jax.experimental import pallas as pl
from jax.experimental.pallas import tpu as pltpu

_LANE = 128
_TARGET_TILE_BYTES = 4 * 1024 * 1024      # ~4 MiB values tile
_VMEM_LIMIT_BYTES = 32 * 1024 * 1024      # explicit scoped-VMEM budget (safe on v5e/v6e/v7x)


def _scale_rows_kernel(s_ref, v_ref, o_ref):
    # s_ref : VMEM (TR, 1)  float32 sqrt(outputscale), one value per row
    # v_ref : VMEM (TR, TL) values dtype
    # o_ref : VMEM (TR, TL) values dtype
    # NOTE: tail blocks (rows/lanes past the array extent) may contain stale
    # data; the corresponding output writes are masked by Pallas, so results
    # stay correct (sqrt is precomputed in the wrapper, so no NaN risk here).
    s = s_ref[...].astype(o_ref.dtype)      # cast (TR,1) only; data stays native dtype
    o_ref[...] = v_ref[...] * s


def _round_tile(size, full, mult):
    """Clamp a tile size to the full extent, otherwise round down to `mult`."""
    if size >= full:
        return full
    size = max(mult, (size // mult) * mult)
    return min(size, full)


def outputscale_transform(values: jax.Array, outputscale: jax.Array) -> jax.Array:
    """Pallas implementation of OutputscaleTransform.forward.

    If `outputscale` is 0-d (kernel has empty batch_shape), the whole tensor is
    multiplied by sqrt(outputscale). Otherwise `outputscale.shape` must equal
    `values.shape[:-2]` and each batch slice of `values` is scaled by
    sqrt(outputscale[batch]).
    """
    orig_shape = values.shape
    dtype = values.dtype
    itemsize = jnp.dtype(dtype).itemsize
    sub_mult = max(8, 32 // itemsize)   # native sublane pack: 8 f32 / 16 bf16 / 32 i8

    # ---- flatten to a lane-dense (total_rows, L) view + per-row sqrt scale ----
    sqrt_scale = jnp.sqrt(outputscale.astype(jnp.float32))
    if outputscale.ndim == 0:
        total = math.prod(orig_shape)
        if total % _LANE == 0:
            rows_per, L = total // _LANE, _LANE
        else:
            rows_per, L = math.prod(orig_shape[:-1]), orig_shape[-1]
        B = 1
        sqrt_scale = sqrt_scale.reshape(1)
    else:
        assert outputscale.shape == orig_shape[:-2], (
            "batched outputscale must match values.shape[:-2]"
        )
        n, m = orig_shape[-2], orig_shape[-1]
        per = n * m
        B = math.prod(outputscale.shape)
        if per % _LANE == 0:
            rows_per, L = per // _LANE, _LANE     # lane-dense flatten of each slice
        else:
            # TODO(synk): ragged last dims (<128 / not a multiple of 128) keep
            # masked partial stores; a pad+split two-call scheme would be lane-dense.
            rows_per, L = n, m
        sqrt_scale = sqrt_scale.reshape(B)

    total_rows = B * rows_per
    vflat = values.reshape(total_rows, L)
    # Per-row scale column (f32, <1% extra HBM traffic) removes per-step sqrt/splat.
    row_scale = jnp.repeat(sqrt_scale, rows_per).reshape(total_rows, 1)

    # ---- tile sizing (~4 MiB value tiles, lane-tiled if the last dim is huge) ----
    if L * itemsize * sub_mult <= _TARGET_TILE_BYTES:
        tl = L
    else:
        tl = _round_tile(_TARGET_TILE_BYTES // (sub_mult * itemsize), L, _LANE)
    tr = _round_tile(_TARGET_TILE_BYTES // max(1, tl * itemsize), total_rows, sub_mult)

    n_lane_tiles = pl.cdiv(L, tl)
    n_row_tiles = pl.cdiv(total_rows, tr)
    # Guarantee >= 2 grid steps when possible so both v7x TensorCores get work.
    if n_row_tiles * n_lane_tiles < 2 and total_rows > sub_mult:
        half = (total_rows + 1) // 2
        tr = min(total_rows, ((half + sub_mult - 1) // sub_mult) * sub_mult)
        n_row_tiles = pl.cdiv(total_rows, tr)

    out = pl.pallas_call(
        _scale_rows_kernel,
        out_shape=jax.ShapeDtypeStruct((total_rows, L), dtype),
        grid=(n_row_tiles, n_lane_tiles),
        in_specs=[
            pl.BlockSpec((tr, 1), lambda r, c: (r, 0)),    # row-scale column
            pl.BlockSpec((tr, tl), lambda r, c: (r, c)),   # values tile
        ],
        out_specs=pl.BlockSpec((tr, tl), lambda r, c: (r, c)),
        compiler_params=pltpu.CompilerParams(
            dimension_semantics=("parallel", "parallel"),
            vmem_limit_bytes=_VMEM_LIMIT_BYTES,
        ),
    )(row_scale, vflat)

    return out.reshape(orig_shape)


if __name__ == "__main__":
    key = jax.random.PRNGKey(0)
    k1, k2, k3, k4, k5, k6 = jax.random.split(key, 6)

    # --- batched, lane-dense slices ---
    values = jax.random.normal(k1, (2, 16, 128), dtype=jnp.float32)
    outputscale = jax.nn.softplus(jax.random.normal(k2, (2,), dtype=jnp.float32))
    out = jax.block_until_ready(outputscale_transform(values, outputscale))
    ref = jnp.sqrt(outputscale)[..., None, None] * values
    assert out.shape == values.shape and out.dtype == values.dtype
    assert jnp.allclose(out, ref, atol=1e-6, rtol=1e-6)

    # --- batched, ragged last dim (masked-store fallback path) ---
    values_r = jax.random.normal(k3, (2, 4, 8, 10), dtype=jnp.float32)
    scale_r = jax.nn.softplus(jax.random.normal(k4, (2, 4), dtype=jnp.float32))
    out_r = jax.block_until_ready(outputscale_transform(values_r, scale_r))
    ref_r = jnp.sqrt(scale_r)[..., None, None] * values_r
    assert jnp.allclose(out_r, ref_r, atol=1e-6, rtol=1e-6)

    # --- scalar outputscale, multiple row tiles ---
    scalar_scale = jax.nn.softplus(jax.random.normal(k5, (), dtype=jnp.float32))
    values_s = jax.random.normal(k1, (4, 64, 32), dtype=jnp.float32)
    out_s = jax.block_until_ready(outputscale_transform(values_s, scalar_scale))
    ref_s = jnp.sqrt(scalar_scale) * values_s
    assert jnp.allclose(out_s, ref_s, atol=1e-6, rtol=1e-6)

    # --- bf16 values (native-dtype multiply on v6e/v7x) ---
    values_b = jax.random.normal(k6, (2, 16, 128), dtype=jnp.bfloat16)
    out_b = jax.block_until_ready(outputscale_transform(values_b, outputscale))
    ref_b = (jnp.sqrt(outputscale)[..., None, None].astype(jnp.bfloat16) * values_b)
    assert out_b.dtype == jnp.bfloat16
    assert jnp.allclose(out_b.astype(jnp.float32), ref_b.astype(jnp.float32),
                        atol=2e-2, rtol=2e-2)

    print("KERNEL_OK")
</pallas_src>

<mosaic_0001>
module attributes {stable_mosaic.version = 11 : i64} {
  func.func @_scale_rows_kernel(%arg0: i32, %arg1: i32, %arg2: memref<16x1xf32, #tpu.memory_space<vmem>>, %arg3: memref<16x128xf32, #tpu.memory_space<vmem>>, %arg4: memref<16x128xf32, #tpu.memory_space<vmem>>) attributes {dimension_semantics = [#tpu.dimension_semantics<parallel>, #tpu.dimension_semantics<parallel>], iteration_bounds = array<i64: 2, 1>, scalar_prefetch = 0 : i64, scratch_operands = 0 : i64, tpu.core_type = #tpu.core_type<tc>, window_params = [{transform_indices = @transform_0, window_bounds = array<i64: 16, 1>}, {transform_indices = @transform_1, window_bounds = array<i64: 16, 128>}, {transform_indices = @transform_2, window_bounds = array<i64: 16, 128>}]} {
    %c0 = arith.constant 0 : index
    %c0_0 = arith.constant 0 : index
    %0 = vector.load %arg2[%c0, %c0_0] : memref<16x1xf32, #tpu.memory_space<vmem>>, vector<16x1xf32>
    %c0_1 = arith.constant 0 : index
    %c0_2 = arith.constant 0 : index
    %1 = vector.load %arg3[%c0_1, %c0_2] : memref<16x128xf32, #tpu.memory_space<vmem>>, vector<16x128xf32>
    %2 = vector.broadcast %0 : vector<16x1xf32> to vector<16x128xf32>
    %3 = arith.mulf %1, %2 : vector<16x128xf32>
    %c0_3 = arith.constant 0 : index
    %c0_4 = arith.constant 0 : index
    %4 = vector.load %arg4[%c0_3, %c0_4] : memref<16x128xf32, #tpu.memory_space<vmem>>, vector<16x128xf32>
    tpu.vector_store %arg4[%c0_3, %c0_4], %3 {strides = array<i32>} : memref<16x128xf32, #tpu.memory_space<vmem>>, vector<16x128xf32>,
    return
  }
  func.func @transform_0(%arg0: i32, %arg1: i32) -> (i32, i32) {
    %c0_i32 = arith.constant 0 : i32
    %c0_i32_0 = arith.constant 0 : i32
    return %arg0, %c0_i32 : i32, i32
  }
  func.func @transform_1(%arg0: i32, %arg1: i32) -> (i32, i32) {
    %c0_i32 = arith.constant 0 : i32
    return %arg0, %arg1 : i32, i32
  }
  func.func @transform_2(%arg0: i32, %arg1: i32) -> (i32, i32) {
    %c0_i32 = arith.constant 0 : i32
    return %arg0, %arg1 : i32, i32
  }
}

</mosaic_0001>

<bundles_post_ra>
// kernel: tpu_custom_call.1
= control target key start
LH: loop header
LB: loop body
LE: loop exit
PB: predicated region body
PF: predicated region fallthrough
CT: control target
= control target key end

     0   :  { %7 = vsyncpa [#allocation3], 0  ;;  %s603_s0 = inlined_call_operand.vmem [shape: f32[32,1], index: 0, kind: input, shape index: {}]   ;;  %s604_s1 = inlined_call_operand.vmem [shape: f32[32,128], index: 1, kind: input, shape index: {}]   ;;  %s605_s2 = inlined_call_operand.hbm [shape: f32[32,128], index: 2, kind: output, shape index: {}]  }
   0x1   :  { %9 = vsyncpa [#allocation3 + $0x1], 0  ;;  %s486_s9 = smov 0   ;;  %s488_s10 = smov 0  }
   0x2   :  { %s490_s11 = smov 0   ;;  %s492_s12 = smov 0  }
   0x3   :  { %s494_s13 = smov 0   ;;  %s496_s14 = smov 0  }
   0x4 LB: > { %s312_s15 = sadd.s32 4294967295, %s465_s14   ;;  %s313_s16 = sadd.s32 4294967294, %s465_s14   ;;  %s465_s14 = sphi %s496_s14, %s15_s14   ;;  %s461_s13 = sphi %s494_s13, %s612_s13   ;;  %s457_s12 = sphi %s492_s12, %s611_s12   ;;  %s453_s11 = sphi %s490_s11, %s610_s11   ;;  %s449_s10 = sphi %s488_s10, %s609_s10   ;;  %s445_s9 = sphi %s486_s9, %s608_s9  }
   0x5   : > { %s27_s17 = sadd.s32 1, %s461_s13  ;;  %s90_s18 = sadd.s32 1, %s453_s11 }
   0x6   : > { %p29_p0 = scmp.ge.s32.totalorder %s27_s17, 2  ;;  %p100_p1 = scmp.ne.s32.totalorder %s453_s11, %s449_s10 }
   0x7   : > { %p101_p2 = scmp.eq.s32.totalorder %s312_s15, 1  ;;  %p106_p3 = scmp.ne.s32.totalorder %s449_s10, %s445_s9 }
   0x8   : > { %s614_s17 = smov (%p29_p0, %s27_s17), 0  ;;  %p107_p5 = scmp.eq.s32.totalorder %s313_s16, 1 }
   0x9   : > { %p526_p4 = por %p101_p2, %p100_p1  ;;  %s85_s20 = ssub.s32 %s461_s13, %s614_s17 }
   0xa   : > { %p316_p6 = scmp.ge.s32.totalorder %s465_s14, 1  ;;  %p88_p7 = scmp.eq.s32.totalorder %s85_s20, 0 }
   0xb   : > { %p533_p8 = por %p107_p5, %p106_p3  ;;  %p146_p9 = scmp.lt.s32.totalorder %s465_s14, 3 }
   0xc   : > { %s539_s22 = scalar_select %p88_p7, %s453_s11, %s90_s18  }
   0xd   : > { %p147_p10 = pnand %p316_p6, %p146_p9 }
   0xe   : > { %s318_s23 = sshll.u32 (!%p147_p10), %s457_s12, 1  ;;  %v467_v0 = vmov (!%p147_p10), 0   ;;  %s173_s28 = sand.u32 (!%p147_p10), 1, %s449_s10  }
   0xf   : > { %150 = sbr.rel (%p147_p10) target bundleno = 175 (0xaf), region = 28  ;;  %386 = vset.pattern.permute.xlu0 (!%p147_p10), %v467_v0  ;;  %p177_p11 = scmp.lt.s32.totalorder (!%p147_p10), %s318_s23, 3 }
  0x10   : > { %s317_s4 = sshll.u32 (!%p147_p10), %s173_s28, 4  ;;  %s327_s7 = sshll.u32 (!%p147_p10), %s457_s12, 8 }
  0x11   : > { %s175_s5 = scalar_lea.vmem (!%p147_p10), [#allocation2], %s317_s4  ;;  %s555_s16 = scalar_lea.hbm (!%p147_p10), %s605_s2, %s327_s7 }
  0x12   : > { %s225_s6 = sshll.u32 (!%p147_p10), %s175_s5, 4  ;;  %s557_s18 = scalar_lea.sflag (!%p147_p10), [#allocation3], %s173_s28  ;;  %s550_s6 = int_to_ptr.vmem [resolvable:$true] %s225_s6 }
  0x13   : > { %s387_s20 = scalar_lea.vmem (!%p147_p10), %s550_s6, 256  ;;  %s468_s12 = smov (!%p147_p10), [#allocation2]  }
  0x14   : > { %p388_p12 = scmp.ne.s32.totalorder (!%p147_p10), %s550_s6, %s387_s20 }
  0x16   : > { %s616_s23 = smov (!%p177_p11, %s318_s23), 3  ;;  %p389_p13 = pnand %p388_p12, %p526_p4 }
  0x17   : > { %s319_s24 = sshll.u32 %s616_s23, 3  ;;  %s391_s23 = sshll.u32 %s468_s12, 4  ;;  %s392_s23 = int_to_ptr.vmem [resolvable:$false] %s391_s23 }
  0x18   : > { %s180_s27 = scalar_lea.vmem %s603_s0, %s319_s24  ;;  %s189_s3 = scalar_lea.vmem %s604_s1, %s319_s24 }
  0x19   : > { %v192_v1 = vld [vmem:[%s180_s27] sm:$0xff]  ;;  %v193_v2 = vld [vmem:[%s180_s27 + $0x8] sm:$0xff]  ;;  %p390_p0 = pneg %p389_p13  ;;  %s393_s24 = scalar_lea.vmem %s392_s23, 512 }
  0x1a   : > { %198 = vperm.xlu0 %386, %v192_v1   ;;  %v194_v3 = vld [vmem:[%s189_s3] sm:$0xff]  ;;  %v195_v6 = vld [vmem:[%s189_s3 + $0x8] sm:$0xff]  ;;  %p394_p1 = scmp.lt.s32.totalorder %s550_s6, %s392_s23  ;;  %p395_p2 = scmp.lt.s32.totalorder %s393_s24, %s387_s20 }
  0x1c   : > { %p396_p3 = por %p395_p2, %p394_p1 }
  0x1e   : > { %203 = vperm.xlu0 %386, %v193_v2   ;;  %p397_p5 = pnand %p396_p3, %p390_p0 }
  0x99   : > { %v199_v4 = vpop.permute.xlu0 %198 }
  0x9a   : > { %v206_v5 = vmul.f32 %v199_v4, %v194_v3 }
  0x9c   : > { %208 = vst [vmem:[%s175_s5] sm:$0xff] %v206_v5 }
  0x9d   : > { %v204_v7 = vpop.permute.xlu0 %203 }
  0x9e   : > { %v207_v8 = vmul.f32 %v204_v7, %v195_v6 }
  0xa0   : > { %209 = vst [vmem:[%s175_s5 + $0x8] sm:$0xff] %v207_v8 }
  0xa1   : > { %400 = shalt.err (!%p397_p5)
}
  0xa2   : > { %s401_s25 = scalar_lea.hbm %s555_s16, 256  ;;  %s405_s28 = scalar_lea.hbm %s605_s2, 512 }
  0xa3   : > { %p402_p6 = scmp.ne.s32.totalorder %s555_s16, %s401_s25  ;;  %p406_p10 = scmp.lt.u32.totalorder %s555_s16, %s605_s2 }
  0xa4   : > { %p407_p11 = scmp.lt.u32.totalorder %s405_s28, %s401_s25  ;;  %p409_p13 = scmp.lt.u32.totalorder %s401_s25, %s555_s16 }
  0xa5   : > { %p403_p7 = pnand %p402_p6, %p526_p4 }
  0xa6   : > { %p408_p12 = por %p407_p11, %p406_p10 }
  0xa7   : > { %p404_p9 = pneg %p403_p7 }
  0xa8   : > { %p410_p0 = por %p409_p13, %p408_p12 }
  0xaa   : > { %p411_p1 = pnand %p410_p0, %p404_p9 }
  0xac   : > { %414 = shalt.err (!%p411_p1)
}
  0xad   : > { %s469_s3 = smov 128   ;;  %s470_s4 = smov 8  }
  0xae   : > { %328 = dma.vmem_to_hbm [thread:$0]  (%p526_p4), %s550_s6, 256, %s555_s16, %s557_s18, %s469_s3, %s469_s3, %s470_s4  }
  0xaf PF: > { %p334_p2 = scmp.ge.s32.totalorder %s465_s14, 2  ;;  %s240_s5 = sand.u32 1, %s445_s9  }
  0xb0   : > { %s241_s7 = scalar_lea.sflag [#allocation3], %s240_s5 }
  0xb1   : > { %p331_p3 = pnand %p334_p2, %p533_p8 }
  0xb3   : > { %440 = dma.done.wait (!%p331_p3), %s241_s7, 256  }
  0xb4   : > { %442 = vsyncadd (!%p331_p3), %s241_s7, 4294967040  ;;  %s15_s14 = sadd.s32 1, %s465_s14   ;;  %s608_s9 = smov %s449_s10 }
  0xb5   : > { %p12_p5 = scmp.ge.s32.totalorder %s15_s14, 4   ;;  %s609_s10 = smov %s453_s11 }
  0xb6   : > { %s610_s11 = smov %s539_s22  ;;  %s611_s12 = smov %s461_s13 }
  0xb7   : > { %s612_s13 = smov %s614_s17  ;;  %14 = sbr.rel (!%p12_p5) target bundleno = 4 (0x4), region = 66 }
  0xbe   :  { %246 = vsyncpa [#allocation3], 1 }
  0xbf   :  { %248 = vsyncpa [#allocation3 + $0x1], 1 }

</bundles_post_ra>
